<compile_context>
chip_gen: v5e
topology: v5e:2x2
jax: 0.10.0
libtpu: 0.0.40
codegen_flags: <defaults>
</compile_context>

<pallas_src>
import functools
import numpy as np
import jax
import jax.numpy as jnp
from jax.experimental import pallas as pl
from jax.experimental.pallas import tpu as pltpu


def _round_up(x, m):
    return ((x + m - 1) // m) * m


def _fused_adapt_kernel(tid_ref, x_ref, w_ref, b_ref, o_ref):
    # tid_ref: SMEM per-tile type-id table (consumed by the index_maps only).
    # x: [TM, D_pad] bf16, w: [D_pad, H] bf16, b: [1, H] f32, o: [TM, H] bf16.
    acc = jnp.dot(x_ref[...], w_ref[...], preferred_element_type=jnp.float32)
    # Bias add stays in f32 on the MXU accumulator (no bf16 VPU path on v5e);
    # a single bf16 store halves the dominant output HBM stream.
    o_ref[...] = (acc + b_ref[...]).astype(o_ref.dtype)


def _choose_tm(max_rows, total_rows, d_pad, h, in_bytes, out_bytes):
    """Largest row tile (multiple of 16, <=1024) whose double-buffered working
    set fits comfortably in v7x's 64 MiB/TC VMEM (trivially fine for the
    128 MiB VMEM of v5e/v6e)."""
    h_lane = _round_up(h, 128)        # VMEM lane padding of the (tm, H) tiles
    budget = 40 << 20                 # ~64 MiB physical minus headroom

    def per_step(t):
        return (2 * t * d_pad * in_bytes           # activation tile (dbl-buffered)
                + 2 * d_pad * h_lane * in_bytes    # weight block
                + 2 * 8 * h_lane * 4               # bias block
                + 2 * t * h_lane * out_bytes)      # output tile

    row_cap = max(16, _round_up(max_rows, 16))
    tm = 16
    for cand in (16, 32, 64, 128, 256, 512, 1024):
        if cand > row_cap:
            break
        if per_step(cand) <= budget:
            tm = cand
    # SMEM guard: the scalar-prefetched tile-type table is a 1-D int32 array
    # (pads to next_pow2(4N) bytes); keep num_tiles bounded for huge graphs.
    while (total_rows // tm) > 32768 and per_step(tm * 2) <= budget:
        tm *= 2
    return tm


@functools.partial(jax.jit, static_argnames=("type_ids", "tm", "d_pad"))
def _fused_adapt_linear(W, B, xs, *, type_ids, tm, d_pad):
    """Fused per-type linear for one feature-dim bucket.

    W: [T, d_pad, H] compute-dtype stacked weights (pre-packed at init).
    B: [T, 1, H]     f32 stacked biases.
    xs: tuple of [N_i, D_i] arrays; type_ids[i] indexes into W/B.
    Returns a list of [N_i, H] compute-dtype outputs.
    """
    cdt = np.dtype(W.dtype)
    H = int(W.shape[-1])

    # Pack every type into row blocks that are multiples of TM so each grid
    # tile belongs to exactly one type; types stay contiguous so the two v7x
    # TensorCores (grid sharded via "parallel") see type-contiguous ranges and
    # don't re-fetch weight blocks at every tile boundary.
    x_blocks, tile_types, offsets, counts = [], [], [], []
    off = 0
    for x, tid in zip(xs, type_ids):
        n, d = int(x.shape[0]), int(x.shape[1])
        n_pad = _round_up(n, tm)
        x_blocks.append(jnp.pad(x.astype(cdt), ((0, n_pad - n), (0, d_pad - d))))
        tile_types += [tid] * (n_pad // tm)
        offsets.append(off)
        counts.append(n)
        off += n_pad
    X = x_blocks[0] if len(x_blocks) == 1 else jnp.concatenate(x_blocks, axis=0)
    N_pad = off
    num_tiles = N_pad // tm
    tile_types_arr = jnp.asarray(tile_types, jnp.int32)

    # Explicit VMEM budget: double-buffered x / w / bias / out tiles with
    # headroom (floor raised to 16 MiB so Mosaic keeps pipelining scratch).
    h_lane = _round_up(H, 128)
    per_step = (2 * tm * d_pad * cdt.itemsize
                + 2 * d_pad * h_lane * cdt.itemsize
                + 2 * 8 * h_lane * 4
                + 2 * tm * h_lane * cdt.itemsize)
    vmem_limit = int(min(48 << 20, max(16 << 20, 3 * per_step)))

    out = pl.pallas_call(
        _fused_adapt_kernel,
        out_shape=jax.ShapeDtypeStruct((N_pad, H), cdt),
        grid_spec=pltpu.PrefetchScalarGridSpec(
            num_scalar_prefetch=1,
            grid=(num_tiles,),
            in_specs=[
                # Row-tiled activations: new tile every grid step.
                pl.BlockSpec((tm, d_pad), lambda i, tid: (i, 0)),
                # Per-tile weight block chosen by the scalar-prefetched type id.
                pl.BlockSpec((None, d_pad, H), lambda i, tid: (tid[i], 0, 0)),
                # Per-tile bias block (tiny), same selection.
                pl.BlockSpec((None, 1, H), lambda i, tid: (tid[i], 0, 0)),
            ],
            # H is not lane-padded: no 4x write amplification when H < 128;
            # if hidden_dim is a multiple of 128 the stores are unmasked.
            out_specs=pl.BlockSpec((tm, H), lambda i, tid: (i, 0)),
        ),
        compiler_params=pltpu.CompilerParams(
            dimension_semantics=("parallel",),
            vmem_limit_bytes=vmem_limit,
        ),
        cost_estimate=pl.CostEstimate(
            flops=2 * N_pad * d_pad * H,
            transcendentals=0,
            bytes_accessed=(X.size * cdt.itemsize + W.size * cdt.itemsize
                            + B.size * 4 + N_pad * H * cdt.itemsize),
        ),
    )(tile_types_arr, X, W, B)

    # Per-type row slices (no column slice needed: H is not padded).
    # TODO(synk): a homogeneous-graph HGTLayer consumer could take the packed
    # buffer + (offset, count) metadata directly and skip these copies.
    return [out[offsets[i]: offsets[i] + counts[i]] for i in range(len(xs))]


class HGTPallas:
    """JAX/Pallas re-implementation of the HGT module's forward pass."""

    def __init__(self, in_dims, hidden_dim, node_dict, edge_dict,
                 n_layers, n_heads, dropout=0.2, key=None,
                 compute_dtype=jnp.bfloat16):
        self.node_dict = node_dict
        self.edge_dict = edge_dict
        self.n_layers = n_layers
        self.n_heads = n_heads
        self.hidden_dim = hidden_dim
        self.compute_dtype = jnp.dtype(compute_dtype)
        if key is None:
            key = jax.random.PRNGKey(0)

        # Deterministic nn.Linear-style init: U(-1/sqrt(in_dim), 1/sqrt(in_dim)).
        # Master weights kept in f32; bf16 copies are pre-packed below.
        self.adapt_ws = {}
        bucket_members = {}
        for i, t in enumerate(sorted(in_dims.keys())):
            d = int(in_dims[t])
            kw, kb = jax.random.split(jax.random.fold_in(key, i))
            bound = 1.0 / np.sqrt(d)
            w = jax.random.uniform(kw, (d, hidden_dim), jnp.float32, -bound, bound)
            b = jax.random.uniform(kb, (1, hidden_dim), jnp.float32, -bound, bound)
            self.adapt_ws[t] = (w, b)
            bucket_members.setdefault(_round_up(d, 128), []).append(t)

        # Packing hoisted out of forward: per feature-dim bucket, stack the
        # zero-padded bf16 weights / f32 biases ONCE and cache them.
        self.type_slot = {}   # type -> (d_pad bucket key, slot index in bucket)
        self.packed_ws = {}   # d_pad -> (W [T, d_pad, H] bf16, B [T, 1, H] f32)
        for d_pad, types in bucket_members.items():
            Ws, Bs = [], []
            for slot, t in enumerate(types):
                w, b = self.adapt_ws[t]
                Ws.append(jnp.pad(w.astype(self.compute_dtype),
                                  ((0, d_pad - w.shape[0]), (0, 0))))
                Bs.append(jnp.reshape(b, (1, hidden_dim)).astype(jnp.float32))
                self.type_slot[t] = (d_pad, slot)
            self.packed_ws[d_pad] = (jnp.stack(Ws), jnp.stack(Bs))

        # TODO(synk): HGTLayer (self.gcs, the n_layers message-passing blocks)
        # is not defined in the provided module source, so it is not reproduced.

    def forward(self, graph):
        """graph = {'node_feats': {ntype: [N_t, D_t]}, 'edge_feats': {etype: [E_t, D_t]}}"""
        entries = []  # (kind, type_name, x) for every type with >0 rows
        for ntype, x in graph["node_feats"].items():
            if x.shape[0] > 0:
                entries.append(("node", ntype, x))
        for etype, x in graph["edge_feats"].items():
            if x.shape[0] > 0:
                entries.append(("edge", etype, x))

        node_h, edge_h = {}, {}
        # One fused, type-indexed pallas_call per feature-dim bucket.
        buckets = {}
        for e in entries:
            buckets.setdefault(self.type_slot[e[1]][0], []).append(e)

        for d_pad, ents in buckets.items():
            xs = tuple(x for _, _, x in ents)
            type_ids = tuple(self.type_slot[t][1] for _, t, _ in ents)
            W, B = self.packed_ws[d_pad]
            max_rows = max(int(x.shape[0]) for x in xs)
            total_rows = sum(int(x.shape[0]) for x in xs)
            # NOTE: tm / shapes are static jit args -> a new graph size
            # recompiles; tm is quantized to a small candidate set to limit
            # recompilation churn in serving.
            tm = _choose_tm(max_rows, total_rows, d_pad, self.hidden_dim,
                            self.compute_dtype.itemsize,
                            self.compute_dtype.itemsize)
            hs = _fused_adapt_linear(W, B, xs, type_ids=type_ids,
                                     tm=tm, d_pad=d_pad)
            for (kind, t, _), h in zip(ents, hs):
                (node_h if kind == "node" else edge_h)[t] = h

        # dgl.to_homogeneous(return_count=True) id bookkeeping (pure index math).
        ntypes = list(graph["node_feats"].keys())
        etypes = list(graph["edge_feats"].keys())
        ntype_count = [graph["node_feats"][t].shape[0] for t in ntypes]
        etype_count = [graph["edge_feats"][t].shape[0] for t in etypes]
        node_id_mapping = np.cumsum(ntype_count)
        edge_id_mapping = np.cumsum(etype_count)
        node_ids_dict, edge_ids_dict = {}, {}
        for i, ntype in enumerate(ntypes):
            lo = 0 if i == 0 else int(node_id_mapping[i - 1])
            node_ids_dict[ntype] = (lo, int(node_id_mapping[i]))
        for i, etype in enumerate(etypes):
            lo = 0 if i == 0 else int(edge_id_mapping[i - 1])
            edge_ids_dict[etype] = [lo, int(edge_id_mapping[i])]

        # TODO(synk): the n_layers HGTLayer passes would be applied here.
        return {
            "node_h": node_h,
            "edge_h": edge_h,
            "node_ids_dict": node_ids_dict,
            "edge_ids_dict": edge_ids_dict,
        }


if __name__ == "__main__":
    key = jax.random.PRNGKey(0)
    hidden_dim = 32
    n_layers = 2
    n_heads = 2

    # Node types + edge type (edge features are also projected via adapt_ws).
    in_dims = {"paper": 16, "author": 24, "writes": 16}
    node_dict = {"paper": 0, "author": 1}
    edge_dict = {"writes": 0}

    k1, k2, k3 = jax.random.split(key, 3)
    graph = {
        "node_feats": {
            "paper": jax.random.normal(k1, (8, 16), jnp.float32),
            "author": jax.random.normal(k2, (12, 24), jnp.float32),
        },
        "edge_feats": {
            "writes": jax.random.normal(k3, (10, 16), jnp.float32),
        },
    }

    model = HGTPallas(in_dims, hidden_dim, node_dict, edge_dict,
                      n_layers, n_heads, dropout=0.2, key=jax.random.PRNGKey(0))
    out = model.forward(graph)

    # Block on all Pallas outputs and check against references.
    for t, h in list(out["node_h"].items()) + list(out["edge_h"].items()):
        jax.block_until_ready(h)
        feats = graph["node_feats"].get(t, graph["edge_feats"].get(t))
        w, b = model.adapt_ws[t]
        assert h.shape == (feats.shape[0], hidden_dim)
        assert h.dtype == model.compute_dtype
        h_f32 = np.asarray(h, dtype=np.float32)
        # Reference for the kernel's computation (bf16 in, f32 accum, bf16 out).
        x_bf = feats.astype(jnp.bfloat16).astype(jnp.float32)
        w_bf = w.astype(jnp.bfloat16).astype(jnp.float32)
        ref_bf = np.asarray(x_bf @ w_bf + b)
        np.testing.assert_allclose(h_f32, ref_bf, rtol=2e-2, atol=2e-2)
        # Loose check against the full-f32 torch.nn.Linear semantics.
        ref_f32 = np.asarray(feats @ w + b)
        np.testing.assert_allclose(h_f32, ref_f32, rtol=1e-1, atol=1e-1)

    print("KERNEL_OK")
</pallas_src>

<mosaic_0001>
module attributes {stable_mosaic.version = 11 : i64} {
  func.func @_fused_adapt_kernel(%arg0: i32, %arg1: memref<3xi32, #tpu.memory_space<smem>>, %arg2: memref<16x128xbf16, #tpu.memory_space<vmem>>, %arg3: memref<1x128x32xbf16, #tpu.memory_space<vmem>>, %arg4: memref<1x1x32xf32, #tpu.memory_space<vmem>>, %arg5: memref<16x32xbf16, #tpu.memory_space<vmem>>) attributes {dimension_semantics = [#tpu.dimension_semantics<parallel>], iteration_bounds = array<i64: 3>, scalar_prefetch = 1 : i64, scratch_operands = 0 : i64, tpu.core_type = #tpu.core_type<tc>, window_params = [{transform_indices = @transform_0, window_bounds = array<i64: 16, 128>}, {transform_indices = @transform_1, window_bounds = array<i64: 1, 128, 32>}, {transform_indices = @transform_2, window_bounds = array<i64: 1, 1, 32>}, {transform_indices = @transform_3, window_bounds = array<i64: 16, 32>}]} {
    %c0 = arith.constant 0 : index
    %c0_0 = arith.constant 0 : index
    %0 = vector.load %arg2[%c0, %c0_0] : memref<16x128xbf16, #tpu.memory_space<vmem>>, vector<16x128xbf16>
    %c0_1 = arith.constant 0 : index
    %c0_2 = arith.constant 0 : index
    %c0_3 = arith.constant 0 : index
    %1 = vector.load %arg3[%c0_1, %c0_2, %c0_3] : memref<1x128x32xbf16, #tpu.memory_space<vmem>>, vector<1x128x32xbf16>
    %2 = vector.shape_cast %1 : vector<1x128x32xbf16> to vector<128x32xbf16>
    %cst = arith.constant dense<0.000000e+00> : vector<16x32xf32>
    %3 = tpu.matmul %0, %2, %cst {dimension_numbers = #tpu.dot_dimension_numbers<[1], [0], [0], [1], [0, 0, 1, 1], [], []>} : vector<16x128xbf16>, vector<128x32xbf16>, vector<16x32xf32> -> vector<16x32xf32>
    %c0_4 = arith.constant 0 : index
    %c0_5 = arith.constant 0 : index
    %c0_6 = arith.constant 0 : index
    %4 = vector.load %arg4[%c0_4, %c0_5, %c0_6] : memref<1x1x32xf32, #tpu.memory_space<vmem>>, vector<1x1x32xf32>
    %5 = vector.shape_cast %4 : vector<1x1x32xf32> to vector<1x32xf32>
    %6 = vector.broadcast %5 : vector<1x32xf32> to vector<16x32xf32>
    %7 = arith.addf %3, %6 : vector<16x32xf32>
    %8 = arith.truncf %7 : vector<16x32xf32> to vector<16x32xbf16>
    %c0_7 = arith.constant 0 : index
    %c0_8 = arith.constant 0 : index
    %9 = vector.load %arg5[%c0_7, %c0_8] : memref<16x32xbf16, #tpu.memory_space<vmem>>, vector<16x32xbf16>
    tpu.vector_store %arg5[%c0_7, %c0_8], %8 {strides = array<i32>} : memref<16x32xbf16, #tpu.memory_space<vmem>>, vector<16x32xbf16>,
    return
  }
  func.func @transform_0(%arg0: i32, %arg1: memref<3xi32, #tpu.memory_space<smem>>) -> (i32, i32) {
    %c0_i32 = arith.constant 0 : i32
    %c0_i32_0 = arith.constant 0 : i32
    return %arg0, %c0_i32 : i32, i32
  }
  func.func @transform_1(%arg0: i32, %arg1: memref<3xi32, #tpu.memory_space<smem>>) -> (i32, i32, i32) {
    %0 = arith.index_cast %arg0 : i32 to index
    %1 = memref.load %arg1[%0] : memref<3xi32, #tpu.memory_space<smem>>
    %c0_i32 = arith.constant 0 : i32
    %c0_i32_0 = arith.constant 0 : i32
    %c0_i32_1 = arith.constant 0 : i32
    return %1, %c0_i32, %c0_i32_0 : i32, i32, i32
  }
  func.func @transform_2(%arg0: i32, %arg1: memref<3xi32, #tpu.memory_space<smem>>) -> (i32, i32, i32) {
    %0 = arith.index_cast %arg0 : i32 to index
    %1 = memref.load %arg1[%0] : memref<3xi32, #tpu.memory_space<smem>>
    %c0_i32 = arith.constant 0 : i32
    %c0_i32_0 = arith.constant 0 : i32
    %c0_i32_1 = arith.constant 0 : i32
    return %1, %c0_i32, %c0_i32_0 : i32, i32, i32
  }
  func.func @transform_3(%arg0: i32, %arg1: memref<3xi32, #tpu.memory_space<smem>>) -> (i32, i32) {
    %c0_i32 = arith.constant 0 : i32
    %c0_i32_0 = arith.constant 0 : i32
    return %arg0, %c0_i32 : i32, i32
  }
}

</mosaic_0001>

<bundles_post_ra>
// kernel: _fused_adapt_linear.1
= control target key start
LH: loop header
LB: loop body
LE: loop exit
PB: predicated region body
PF: predicated region fallthrough
CT: control target
= control target key end

     0   :  { %s494_s18 = smov [#allocation3]   ;;  %s546_s0 = inlined_call_operand.vmem [shape: s32[3], index: 0, kind: input, shape index: {}]   ;;  %s547_s1 = inlined_call_operand.vmem [shape: bf16[48,128], index: 1, kind: input, shape index: {}]   ;;  %s548_s2 = inlined_call_operand.vmem [shape: bf16[3,128,32], index: 2, kind: input, shape index: {}]   ;;  %s549_s3 = inlined_call_operand.vmem [shape: f32[3,1,32], index: 3, kind: input, shape index: {}]   ;;  %s550_s4 = inlined_call_operand.vmem [shape: bf16[48,32], index: 4, kind: output, shape index: {}]  }
   0x1   :  { %s10_s17 = sshll.u32 %s546_s0, 4  ;;  %s11_s17 = int_to_ptr.vmem [resolvable:$true] %s10_s17 }
   0x2   :  { %13 = dma.vmem_to_smem %s11_s17, 16, %s494_s18, [#allocation2] }
   0x3   :  { %488 = dma.done.wait [#allocation2], 16 }
   0x4   :  { %489 = vsyncadd [#allocation2], 4294967280 }
   0x5   :  { %16 = sfence }
   0x6   :  { %s523_s19 = smov 0  }
   0x7 LB: > { %s403_s20 = sadd.s32 4294967295, %s492_s19   ;;  %p407_p0 = scmp.ge.s32.totalorder %s492_s19, 1  ;;  %s492_s19 = sphi %s523_s19, %s22_s19  }
   0x8   : > { %p173_p1 = scmp.lt.s32.totalorder %s492_s19, 4 }
   0xa   : > { %p174_p2 = pnand %p407_p0, %p173_p1 }
   0xb   : > { %s213_s0 = sld [smem:[#allocation3 + %s403_s20]] (!%p174_p2)  ;;  %s408_s29 = sshll.u32 (!%p174_p2), %s403_s20, 1 }
   0xc   : > { %177 = sbr.rel (%p174_p2) target bundleno = 193 (0xc1), region = 32  ;;  %s220_s21 = sld [smem:[#allocation3 + %s403_s20]] (!%p174_p2) }
   0xd   : > { %p208_p5 = scmp.lt.s32.totalorder (!%p174_p2), %s408_s29, 5 }
  0x11   : > { %p214_p3 = scmp.lt.s32.totalorder %s213_s0, 2  ;;  %s556_s29 = smov (!%p208_p5, %s408_s29), 5  ;;  %vm323_vm0 = vcmask 257024  }
  0x12   : > { %p221_p4 = scmp.lt.s32.totalorder %s220_s21, 2  ;;  %s409_s30 = sshll.u32 %s556_s29, 2 }
  0x13   : > { %s552_s0 = smov (!%p214_p3, %s213_s0), 2  ;;  %s211_s7 = scalar_lea.vmem %s547_s1, %s409_s30 }
  0x14   : > { %s554_s21 = smov (!%p221_p4, %s220_s21), 2  ;;  %s452_s22 = sshll.u32 %s552_s0, 6  ;;  %v453_v8 = vld [vmem:[%s211_s7] sm:$0xff] }
  0x15   : > { %s218_s25 = scalar_lea.vmem %s548_s2, %s452_s22  ;;  %s223_s28 = scalar_lea.vmem %s549_s3, %s554_s21 }
  0x16   : > { %v461_v0 = vld [vmem:[%s218_s25 + $0x38] sm:$0xff]  ;;  %v460_v1 = vld [vmem:[%s218_s25 + $0x30] sm:$0xff]  ;;  %v459_v2 = vld [vmem:[%s218_s25 + $0x28] sm:$0xff]  ;;  %s229_s10 = scalar_lea.vmem %s550_s4, %s409_s30 }
  0x17   : > { %307 = vmatpush.bf16.msra.mxu0 %v461_v0  ;;  %v458_v3 = vld [vmem:[%s218_s25 + $0x20] sm:$0xff]  ;;  %v457_v4 = vld [vmem:[%s218_s25 + $0x18] sm:$0xff]  ;;  %v456_v5 = vld [vmem:[%s218_s25 + $0x10] sm:$0xff] }
  0x18   : > { %v455_v6 = vld [vmem:[%s218_s25 + $0x8] sm:$0xff]  ;;  %v454_v7 = vld [vmem:[%s218_s25] sm:$0xff] }
  0x19   : > { %v471_v9 = vld [vmem:[%s223_s28] ss:$0 sm:$0xff] }
  0x1b   : > { %308 = vmatpush.bf16.msra.mxu0 %v460_v1 }
  0x1f   : > { %309 = vmatpush.bf16.msra.mxu0 %v459_v2 }
  0x23   : > { %310 = vmatpush.bf16.msra.mxu0 %v458_v3 }
  0x27   : > { %311 = vmatpush.bf16.msra.mxu0 %v457_v4 }
  0x2b   : > { %312 = vmatpush.bf16.msra.mxu0 %v456_v5 }
  0x2f   : > { %313 = vmatpush.bf16.msra.mxu0 %v455_v6 }
  0x33   : > { %314 = vmatpush.bf16.msra.mxu0 %v454_v7 }
  0x36   : > { %315 = vmatmul.bf16.vlgmr.msra.gmra.mxu0 %v453_v8 }
  0xb3   : > { %v316_v10 = vpop.f32.mrf.mxu0 }
  0xb4   : > { %v317_v11 = vadd.f32 %v471_v9, %v316_v10 }
  0xb6   : > { %v321_v12 = vpack.c.bf16 %v317_v11, %v317_v11 }
  0xb8   : > { %324 = vst.msk [vmem:[%s229_s10] sm:$0xf] %vm323_vm0, %v321_v12 }
  0xbb   : > { %v318_v13 = vpop.f32.mrf.mxu0 }
  0xbc   : > { %v319_v14 = vadd.f32 %v471_v9, %v318_v13 }
  0xbe   : > { %v322_v15 = vpack.c.bf16 %v319_v14, %v319_v14 }
  0xc0   : > { %325 = vst.msk [vmem:[%s229_s10 + $0x4] sm:$0xf] %vm323_vm0, %v322_v15 }
  0xc1 PF: > { %s22_s19 = sadd.s32 1, %s492_s19  }
  0xc2   : > { %p19_p6 = scmp.ge.s32.totalorder %s22_s19, 5  }
  0xc4   :  { %21 = sbr.rel (!%p19_p6) target bundleno = 7 (0x7), region = 68 }

</bundles_post_ra>
